<compile_context>
chip_gen: v6e
topology: v6e:2x2x1
jax: 0.10.0
libtpu: 0.0.40
codegen_flags: <defaults>
</compile_context>

<pallas_src>
import functools

import jax
import jax.numpy as jnp
from jax.experimental import pallas as pl
from jax.experimental.pallas import tpu as pltpu

SIGMA_MIN = 1e-4


def _cdiv(a, b):
    return (a + b - 1) // b


def _round_up(x, m):
    return ((x + m - 1) // m) * m


def _make_cfm_euler_kernel(n_timesteps):
    """One (batch b, time-tile i) block; all Euler steps unrolled in-kernel."""

    def kernel(params_ref,   # SMEM (2,) f32: [t0, dt]
               x_ref,        # VMEM (C, tT)  initial state slice (batch dim squeezed)
               mask_ref,     # VMEM (1, tT)
               w_ref,        # VMEM (C, C)   estimator weight
               b_ref,        # VMEM (C, 1)   estimator bias column
               traj_ref):    # VMEM (n_steps, C, tT) output block (batch squeezed)
        t0 = params_ref[0]
        dt = params_ref[1]
        C, tT = x_ref.shape

        # Hoisted out of the step loop (JAX does not CSE broadcast_in_dim):
        mask_b = jnp.broadcast_to(mask_ref[...], (C, tT))   # sublane broadcast, once
        bias_m = b_ref[...] * mask_b                        # (C,1)*(C,tT): lane bcast + mask, once
        w = w_ref[...]

        # ODE state carried as a local value; trajectory stores are write-only.
        x = x_ref[...]
        traj_ref[0] = x.astype(traj_ref.dtype)

        # Small static step count (Matcha uses ~10): fully unrolled Python loop,
        # every trajectory index static, scheduler sees the whole chain and can
        # overlap each store with the next step's (tiny, mem-bound) matmul.
        for s in range(n_timesteps):
            t = t0 + dt * s
            # (W @ x + t*b) * mask  ==  (W @ x)*mask + t*(b*mask)
            v = (jnp.dot(w, x, preferred_element_type=jnp.float32,
                         precision=jax.lax.Precision.HIGHEST) * mask_b
                 + t * bias_m)
            x = x + dt * v
            traj_ref[s + 1] = x.astype(traj_ref.dtype)

    return kernel


@functools.partial(
    jax.jit,
    static_argnames=("n_timesteps", "temperature", "alpha", "lane_tile",
                     "traj_dtype"))
def basecfm_forward(xp, tp, logsigma_p, mask, w_est, b_est, rng_key, *,
                    n_timesteps, temperature=1.0, alpha=1.0, lane_tile=1024,
                    traj_dtype=jnp.float32):
    """Mirror of BASECFM.forward (solver='euler').

    Returns (trajectory[(n_timesteps+1), B, C, T], tp_new, sqrt(sigma_p_new))
    with the scalars left on device (no host sync here).
    """
    B, C, T = xp.shape
    f32 = jnp.float32
    xp = xp.astype(f32)
    mask = mask.astype(f32)
    tp = tp.astype(f32)

    # ---- scalar glue (exact same math as the PyTorch module) ----
    sigma_p = jnp.exp(logsigma_p.astype(f32))
    Delta = jnp.maximum(alpha * (jnp.sqrt(sigma_p) + (1.0 - SIGMA_MIN) * tp), 1.0)
    tp_new = alpha * tp / Delta
    sigma_p_new = (alpha ** 2) * sigma_p / (Delta ** 2)
    scale = jnp.asarray(alpha, f32) / Delta
    coef = jnp.sqrt(jnp.maximum((1.0 - (1.0 - SIGMA_MIN) * tp_new) ** 2
                                - sigma_p_new, 0.0))

    t0 = tp_new                                   # t_span = linspace(tp, 1, n+1)
    dt = (1.0 - t0) / n_timesteps

    # Pre-fused initial state (one HBM input instead of x0 + xp):
    # x = coef * (temperature * randn_like(xp)) + (alpha/Delta) * xp
    x0 = jax.random.normal(rng_key, xp.shape, dtype=f32)
    x_init = coef * (jnp.asarray(temperature, f32) * x0) + scale * xp   # (B,C,T)

    n_steps = n_timesteps + 1

    # ---- tiling: grid = (B, T tiles); output in final layout ----
    # Per-tile VMEM estimate (double-buffered blocks + kernel-local broadcasts),
    # in bytes; output block dominates.
    def est_vmem(tt):
        dbl = 2 * 4 * (n_steps * C * tt      # trajectory out block
                       + C * tt              # x_init block
                       + 8 * tt              # mask block (padded to 8 sublanes)
                       + C * C               # W
                       + C * 128)            # bias column (padded to 128 lanes)
        local = 2 * 4 * C * tt               # hoisted mask_b / bias_m values
        return dbl + local

    VMEM_BUDGET = 40 * 1024 * 1024            # safe for v7x (64 MiB/TC) & v5e/v6e

    n_t_tiles = max(1, _cdiv(T, lane_tile))
    if B * n_t_tiles < 2 and T > 128:
        n_t_tiles = 2                         # >=2 grid blocks: pipelining + 2nd TC (v7x)
    tT = _round_up(_cdiv(T, n_t_tiles), 128)
    while tT > 128 and est_vmem(tT) > VMEM_BUDGET:
        n_t_tiles += 1
        tT = _round_up(_cdiv(T, n_t_tiles), 128)
    T_pad = tT * n_t_tiles

    if T_pad != T:
        pad = ((0, 0), (0, 0), (0, T_pad - T))
        x_init = jnp.pad(x_init, pad)
        mask = jnp.pad(mask, pad)

    b_col = jnp.reshape(b_est.astype(f32), (C, 1))        # tiny bias column
    params = jnp.stack([t0, dt]).astype(f32)

    vmem_limit = min(max(int(est_vmem(tT) * 1.3) + (4 << 20), 32 << 20), 56 << 20)

    grid_spec = pltpu.PrefetchScalarGridSpec(
        num_scalar_prefetch=0,
        grid=(B, n_t_tiles),
        in_specs=[
            pl.BlockSpec(memory_space=pltpu.MemorySpace.SMEM),      # params [t0, dt]
            pl.BlockSpec((None, C, tT), lambda b, i: (b, 0, i)),    # x_init (B,C,T)
            pl.BlockSpec((None, 1, tT), lambda b, i: (b, 0, i)),    # mask   (B,1,T)
            pl.BlockSpec((C, C), lambda b, i: (0, 0)),              # W
            pl.BlockSpec((C, 1), lambda b, i: (0, 0)),              # bias column
        ],
        out_specs=pl.BlockSpec((n_steps, None, C, tT),
                               lambda b, i: (0, b, 0, i)),          # final layout
    )

    trajectory = pl.pallas_call(
        _make_cfm_euler_kernel(n_timesteps),
        out_shape=jax.ShapeDtypeStruct((n_steps, B, C, T_pad), traj_dtype),
        grid_spec=grid_spec,
        compiler_params=pltpu.CompilerParams(
            dimension_semantics=("parallel", "parallel"),
            vmem_limit_bytes=vmem_limit),
    )(params, x_init, mask, w_est.astype(f32), b_col)

    if T_pad != T:
        trajectory = trajectory[..., :T]      # cheap un-pad; no transpose needed

    return trajectory, tp_new, jnp.sqrt(sigma_p_new)


if __name__ == "__main__":
    key = jax.random.PRNGKey(0)
    k_xp, k_tp, k_ls, k_w, k_b, k_noise = jax.random.split(key, 6)

    B, C, T = 2, 8, 128          # batch, n_feats, time frames
    n_timesteps = 4

    xp = jax.random.normal(k_xp, (B, C, T), dtype=jnp.float32)
    tp = jax.random.uniform(k_tp, (), dtype=jnp.float32) * 0.5     # like tp.item()
    logsigma_p = jax.random.normal(k_ls, (), dtype=jnp.float32) * 0.1 - 2.0

    # mask (B, 1, T): first sample fully valid, second valid for the first half
    mask = jnp.ones((B, 1, T), dtype=jnp.float32)
    mask = mask.at[1, 0, T // 2:].set(0.0)

    # deterministic synthetic estimator params (abstract in BASECFM)
    w_est = 0.05 * jax.random.normal(k_w, (C, C), dtype=jnp.float32)
    b_est = 0.1 * jax.random.normal(k_b, (1, C, 1), dtype=jnp.float32)

    traj, tp_dev, sqrt_sigma_dev = basecfm_forward(
        xp, tp, logsigma_p, mask, w_est, b_est, k_noise,
        n_timesteps=n_timesteps, temperature=0.8, alpha=1.0)

    traj = jax.block_until_ready(traj)
    assert traj.shape == (n_timesteps + 1, B, C, T)
    assert bool(jnp.all(jnp.isfinite(traj)))

    # masked time columns must carry the frozen initial state through all steps
    assert bool(jnp.allclose(traj[-1, 1, :, T // 2:], traj[0, 1, :, T // 2:]))

    # host transfer only here, outside the wrapper (no sync inside the forward)
    tp_item = float(tp_dev)
    sqrt_sigma_item = float(sqrt_sigma_dev)
    assert 0.0 <= tp_item <= 1.0 and sqrt_sigma_item >= 0.0
    print("KERNEL_OK")
</pallas_src>

<mosaic_0001>
module attributes {stable_mosaic.version = 11 : i64} {
  func.func @kernel(%arg0: i32, %arg1: i32, %arg2: memref<2xf32, #tpu.memory_space<smem>>, %arg3: memref<1x8x128xf32, #tpu.memory_space<vmem>>, %arg4: memref<1x1x128xf32, #tpu.memory_space<vmem>>, %arg5: memref<8x8xf32, #tpu.memory_space<vmem>>, %arg6: memref<8x1xf32, #tpu.memory_space<vmem>>, %arg7: memref<5x1x8x128xf32, #tpu.memory_space<vmem>>) attributes {dimension_semantics = [#tpu.dimension_semantics<parallel>, #tpu.dimension_semantics<parallel>], iteration_bounds = array<i64: 2, 1>, scalar_prefetch = 0 : i64, scratch_operands = 0 : i64, tpu.core_type = #tpu.core_type<tc>, window_params = [{transform_indices = @transform_0, window_bounds = array<i64: 2>}, {transform_indices = @transform_1, window_bounds = array<i64: 1, 8, 128>}, {transform_indices = @transform_2, window_bounds = array<i64: 1, 1, 128>}, {pipeline_mode = #tpu.pipeline_mode<synchronous>, transform_indices = @transform_3, window_bounds = array<i64: 8, 8>}, {pipeline_mode = #tpu.pipeline_mode<synchronous>, transform_indices = @transform_4, window_bounds = array<i64: 8, 1>}, {transform_indices = @transform_5, window_bounds = array<i64: 5, 1, 8, 128>}]} {
    %c0 = arith.constant 0 : index
    %0 = memref.load %arg2[%c0] : memref<2xf32, #tpu.memory_space<smem>>
    %c1 = arith.constant 1 : index
    %1 = memref.load %arg2[%c1] : memref<2xf32, #tpu.memory_space<smem>>
    %c0_0 = arith.constant 0 : index
    %c0_1 = arith.constant 0 : index
    %c0_2 = arith.constant 0 : index
    %2 = vector.load %arg4[%c0_0, %c0_1, %c0_2] : memref<1x1x128xf32, #tpu.memory_space<vmem>>, vector<1x1x128xf32>
    %3 = vector.shape_cast %2 : vector<1x1x128xf32> to vector<1x128xf32>
    %4 = vector.shape_cast %3 : vector<1x128xf32> to vector<1x128xf32>
    %5 = vector.broadcast %4 : vector<1x128xf32> to vector<8x128xf32>
    %c0_3 = arith.constant 0 : index
    %c0_4 = arith.constant 0 : index
    %6 = vector.load %arg6[%c0_3, %c0_4] : memref<8x1xf32, #tpu.memory_space<vmem>>, vector<8x1xf32>
    %7 = vector.broadcast %6 : vector<8x1xf32> to vector<8x128xf32>
    %8 = arith.mulf %7, %5 : vector<8x128xf32>
    %c0_5 = arith.constant 0 : index
    %c0_6 = arith.constant 0 : index
    %9 = vector.load %arg5[%c0_5, %c0_6] : memref<8x8xf32, #tpu.memory_space<vmem>>, vector<8x8xf32>
    %c0_7 = arith.constant 0 : index
    %c0_8 = arith.constant 0 : index
    %c0_9 = arith.constant 0 : index
    %10 = vector.load %arg3[%c0_7, %c0_8, %c0_9] : memref<1x8x128xf32, #tpu.memory_space<vmem>>, vector<1x8x128xf32>
    %11 = vector.shape_cast %10 : vector<1x8x128xf32> to vector<8x128xf32>
    %c0_10 = arith.constant 0 : index
    %c0_11 = arith.constant 0 : index
    %c0_12 = arith.constant 0 : index
    %c0_13 = arith.constant 0 : index
    %12 = vector.load %arg7[%c0_10, %c0_11, %c0_12, %c0_13] : memref<5x1x8x128xf32, #tpu.memory_space<vmem>>, vector<1x1x8x128xf32>
    %13 = vector.shape_cast %12 : vector<1x1x8x128xf32> to vector<8x128xf32>
    %14 = vector.shape_cast %11 : vector<8x128xf32> to vector<1x1x8x128xf32>
    tpu.vector_store %arg7[%c0_10, %c0_11, %c0_12, %c0_13], %14 {strides = array<i32>} : memref<5x1x8x128xf32, #tpu.memory_space<vmem>>, vector<1x1x8x128xf32>,
    %cst = arith.constant 0.000000e+00 : f32
    %15 = arith.mulf %1, %cst : f32
    %16 = arith.addf %0, %15 : f32
    %cst_14 = arith.constant dense<0.000000e+00> : vector<8x128xf32>
    %17 = tpu.matmul %9, %11, %cst_14 {dimension_numbers = #tpu.dot_dimension_numbers<[1], [0], [0], [1], [0, 0, 1, 1], [], []>, precision = #tpu.contract_precision<fp32>} : vector<8x8xf32>, vector<8x128xf32>, vector<8x128xf32> -> vector<8x128xf32>
    %18 = arith.mulf %17, %5 : vector<8x128xf32>
    %19 = vector.broadcast %16 : f32 to vector<8x128xf32>
    %20 = arith.mulf %19, %8 : vector<8x128xf32>
    %21 = arith.addf %18, %20 : vector<8x128xf32>
    %22 = vector.broadcast %1 : f32 to vector<8x128xf32>
    %23 = arith.mulf %22, %21 : vector<8x128xf32>
    %24 = arith.addf %11, %23 : vector<8x128xf32>
    %c1_15 = arith.constant 1 : index
    %c0_16 = arith.constant 0 : index
    %c0_17 = arith.constant 0 : index
    %c0_18 = arith.constant 0 : index
    %25 = vector.load %arg7[%c1_15, %c0_16, %c0_17, %c0_18] : memref<5x1x8x128xf32, #tpu.memory_space<vmem>>, vector<1x1x8x128xf32>
    %26 = vector.shape_cast %25 : vector<1x1x8x128xf32> to vector<8x128xf32>
    %27 = vector.shape_cast %24 : vector<8x128xf32> to vector<1x1x8x128xf32>
    tpu.vector_store %arg7[%c1_15, %c0_16, %c0_17, %c0_18], %27 {strides = array<i32>} : memref<5x1x8x128xf32, #tpu.memory_space<vmem>>, vector<1x1x8x128xf32>,
    %cst_19 = arith.constant 1.000000e+00 : f32
    %28 = arith.mulf %1, %cst_19 : f32
    %29 = arith.addf %0, %28 : f32
    %cst_20 = arith.constant dense<0.000000e+00> : vector<8x128xf32>
    %30 = tpu.matmul %9, %24, %cst_20 {dimension_numbers = #tpu.dot_dimension_numbers<[1], [0], [0], [1], [0, 0, 1, 1], [], []>, precision = #tpu.contract_precision<fp32>} : vector<8x8xf32>, vector<8x128xf32>, vector<8x128xf32> -> vector<8x128xf32>
    %31 = arith.mulf %30, %5 : vector<8x128xf32>
    %32 = vector.broadcast %29 : f32 to vector<8x128xf32>
    %33 = arith.mulf %32, %8 : vector<8x128xf32>
    %34 = arith.addf %31, %33 : vector<8x128xf32>
    %35 = vector.broadcast %1 : f32 to vector<8x128xf32>
    %36 = arith.mulf %35, %34 : vector<8x128xf32>
    %37 = arith.addf %24, %36 : vector<8x128xf32>
    %c2 = arith.constant 2 : index
    %c0_21 = arith.constant 0 : index
    %c0_22 = arith.constant 0 : index
    %c0_23 = arith.constant 0 : index
    %38 = vector.load %arg7[%c2, %c0_21, %c0_22, %c0_23] : memref<5x1x8x128xf32, #tpu.memory_space<vmem>>, vector<1x1x8x128xf32>
    %39 = vector.shape_cast %38 : vector<1x1x8x128xf32> to vector<8x128xf32>
    %40 = vector.shape_cast %37 : vector<8x128xf32> to vector<1x1x8x128xf32>
    tpu.vector_store %arg7[%c2, %c0_21, %c0_22, %c0_23], %40 {strides = array<i32>} : memref<5x1x8x128xf32, #tpu.memory_space<vmem>>, vector<1x1x8x128xf32>,
    %cst_24 = arith.constant 2.000000e+00 : f32
    %41 = arith.mulf %1, %cst_24 : f32
    %42 = arith.addf %0, %41 : f32
    %cst_25 = arith.constant dense<0.000000e+00> : vector<8x128xf32>
    %43 = tpu.matmul %9, %37, %cst_25 {dimension_numbers = #tpu.dot_dimension_numbers<[1], [0], [0], [1], [0, 0, 1, 1], [], []>, precision = #tpu.contract_precision<fp32>} : vector<8x8xf32>, vector<8x128xf32>, vector<8x128xf32> -> vector<8x128xf32>
    %44 = arith.mulf %43, %5 : vector<8x128xf32>
    %45 = vector.broadcast %42 : f32 to vector<8x128xf32>
    %46 = arith.mulf %45, %8 : vector<8x128xf32>
    %47 = arith.addf %44, %46 : vector<8x128xf32>
    %48 = vector.broadcast %1 : f32 to vector<8x128xf32>
    %49 = arith.mulf %48, %47 : vector<8x128xf32>
    %50 = arith.addf %37, %49 : vector<8x128xf32>
    %c3 = arith.constant 3 : index
    %c0_26 = arith.constant 0 : index
    %c0_27 = arith.constant 0 : index
    %c0_28 = arith.constant 0 : index
    %51 = vector.load %arg7[%c3, %c0_26, %c0_27, %c0_28] : memref<5x1x8x128xf32, #tpu.memory_space<vmem>>, vector<1x1x8x128xf32>
    %52 = vector.shape_cast %51 : vector<1x1x8x128xf32> to vector<8x128xf32>
    %53 = vector.shape_cast %50 : vector<8x128xf32> to vector<1x1x8x128xf32>
    tpu.vector_store %arg7[%c3, %c0_26, %c0_27, %c0_28], %53 {strides = array<i32>} : memref<5x1x8x128xf32, #tpu.memory_space<vmem>>, vector<1x1x8x128xf32>,
    %cst_29 = arith.constant 3.000000e+00 : f32
    %54 = arith.mulf %1, %cst_29 : f32
    %55 = arith.addf %0, %54 : f32
    %cst_30 = arith.constant dense<0.000000e+00> : vector<8x128xf32>
    %56 = tpu.matmul %9, %50, %cst_30 {dimension_numbers = #tpu.dot_dimension_numbers<[1], [0], [0], [1], [0, 0, 1, 1], [], []>, precision = #tpu.contract_precision<fp32>} : vector<8x8xf32>, vector<8x128xf32>, vector<8x128xf32> -> vector<8x128xf32>
    %57 = arith.mulf %56, %5 : vector<8x128xf32>
    %58 = vector.broadcast %55 : f32 to vector<8x128xf32>
    %59 = arith.mulf %58, %8 : vector<8x128xf32>
    %60 = arith.addf %57, %59 : vector<8x128xf32>
    %61 = vector.broadcast %1 : f32 to vector<8x128xf32>
    %62 = arith.mulf %61, %60 : vector<8x128xf32>
    %63 = arith.addf %50, %62 : vector<8x128xf32>
    %c4 = arith.constant 4 : index
    %c0_31 = arith.constant 0 : index
    %c0_32 = arith.constant 0 : index
    %c0_33 = arith.constant 0 : index
    %64 = vector.load %arg7[%c4, %c0_31, %c0_32, %c0_33] : memref<5x1x8x128xf32, #tpu.memory_space<vmem>>, vector<1x1x8x128xf32>
    %65 = vector.shape_cast %64 : vector<1x1x8x128xf32> to vector<8x128xf32>
    %66 = vector.shape_cast %63 : vector<8x128xf32> to vector<1x1x8x128xf32>
    tpu.vector_store %arg7[%c4, %c0_31, %c0_32, %c0_33], %66 {strides = array<i32>} : memref<5x1x8x128xf32, #tpu.memory_space<vmem>>, vector<1x1x8x128xf32>,
    return
  }
  func.func @transform_0(%arg0: i32, %arg1: i32) -> i32 {
    %c0_i32 = arith.constant 0 : i32
    %c0_i32_0 = arith.constant 0 : i32
    return %c0_i32 : i32
  }
  func.func @transform_1(%arg0: i32, %arg1: i32) -> (i32, i32, i32) {
    %c0_i32 = arith.constant 0 : i32
    %c0_i32_0 = arith.constant 0 : i32
    return %arg0, %c0_i32, %arg1 : i32, i32, i32
  }
  func.func @transform_2(%arg0: i32, %arg1: i32) -> (i32, i32, i32) {
    %c0_i32 = arith.constant 0 : i32
    %c0_i32_0 = arith.constant 0 : i32
    return %arg0, %c0_i32, %arg1 : i32, i32, i32
  }
  func.func @transform_3(%arg0: i32, %arg1: i32) -> (i32, i32) {
    %c0_i32 = arith.constant 0 : i32
    %c0_i32_0 = arith.constant 0 : i32
    %c0_i32_1 = arith.constant 0 : i32
    return %c0_i32, %c0_i32_0 : i32, i32
  }
  func.func @transform_4(%arg0: i32, %arg1: i32) -> (i32, i32) {
    %c0_i32 = arith.constant 0 : i32
    %c0_i32_0 = arith.constant 0 : i32
    %c0_i32_1 = arith.constant 0 : i32
    return %c0_i32, %c0_i32_0 : i32, i32
  }
  func.func @transform_5(%arg0: i32, %arg1: i32) -> (i32, i32, i32, i32) {
    %c0_i32 = arith.constant 0 : i32
    %c0_i32_0 = arith.constant 0 : i32
    %c0_i32_1 = arith.constant 0 : i32
    return %c0_i32, %arg0, %c0_i32_0, %arg1 : i32, i32, i32, i32
  }
}

</mosaic_0001>

<bundles_post_ra>
// kernel: basecfm_forward.1
= control target key start
LH: loop header
LB: loop body
LE: loop exit
PB: predicated region body
PF: predicated region fallthrough
CT: control target
= control target key end

     0   :  { %10 = vsyncpa [#allocation4], 0  ;;  %s2940_s0 = inlined_call_operand.vmem [shape: f32[2], index: 0, kind: input, shape index: {}]   ;;  %s2941_s1 = inlined_call_operand.vmem [shape: f32[2,8,128], index: 1, kind: input, shape index: {}]   ;;  %s2942_s2 = inlined_call_operand.vmem [shape: f32[2,1,128], index: 2, kind: input, shape index: {}]   ;;  %s2943_s3 = inlined_call_operand.vmem [shape: f32[8,8], index: 3, kind: input, shape index: {}]   ;;  %s2944_s4 = inlined_call_operand.vmem [shape: f32[8,1], index: 4, kind: input, shape index: {}]   ;;  %s2945_s5 = inlined_call_operand.hbm [shape: f32[5,2,8,128], index: 5, kind: output, shape index: {}]  }
   0x1   :  { %11 = vsyncpa [#allocation3], 0 }
   0x2   :  { %13 = vsyncpa [#allocation3 + $0x1], 0  ;;  %s2637_s18 = smov 0   ;;  %s2639_s19 = smov 0  }
   0x3   :  { %s2641_s20 = smov 0   ;;  %s2643_s21 = smov 0  }
   0x4   :  { %s2645_s22 = smov 0   ;;  %s2647_s23 = smov 0  }
   0x5 LB: > { %s2243_s24 = sadd.s32 4294967295, %s2597_s23   ;;  %s2244_s25 = sadd.s32 4294967294, %s2597_s23   ;;  %s2597_s23 = sphi %s2647_s23, %s19_s23   ;;  %s2593_s22 = sphi %s2645_s22, %s2954_s22   ;;  %s2589_s21 = sphi %s2643_s21, %s2953_s21   ;;  %s2585_s20 = sphi %s2641_s20, %s2952_s20   ;;  %s2581_s19 = sphi %s2639_s19, %s2951_s19   ;;  %s2577_s18 = sphi %s2637_s18, %s2950_s18  }
   0x6   : > { %s31_s26 = sadd.s32 1, %s2593_s22  ;;  %s159_s27 = sadd.s32 1, %s2585_s20 }
   0x7   : > { %p33_p0 = scmp.ge.s32.totalorder %s31_s26, 2  ;;  %p169_p1 = scmp.ne.s32.totalorder %s2585_s20, %s2581_s19 }
   0x8   : > { %p170_p2 = scmp.eq.s32.totalorder %s2243_s24, 1  ;;  %p175_p3 = scmp.ne.s32.totalorder %s2581_s19, %s2577_s18 }
   0x9   : > { %s2956_s26 = smov (%p33_p0, %s31_s26), 0  ;;  %p176_p5 = scmp.eq.s32.totalorder %s2244_s25, 1 }
   0xa   : > { %p2677_p4 = por %p170_p2, %p169_p1  ;;  %s154_s29 = ssub.s32 %s2593_s22, %s2956_s26 }
   0xb   : > { %p2245_p6 = scmp.ge.s32.totalorder %s2597_s23, 1  ;;  %p157_p7 = scmp.eq.s32.totalorder %s154_s29, 0 }
   0xc   : > { %p2684_p8 = por %p176_p5, %p175_p3  ;;  %p183_p9 = scmp.lt.s32.totalorder %s2597_s23, 3 }
   0xd   : > { %s2690_s6 = scalar_select %p157_p7, %s2585_s20, %s159_s27  }
   0xe   : > { %p2692_p10 = pnand %p2245_p6, %p183_p9  ;;  %p2696_p11 = scmp.eq.s32.totalorder %s2243_s24, 0 }
   0xf   : > { %s196_s11 = sshll.u32 %s2940_s0, 4  ;;  %s197_s11 = int_to_ptr.vmem [resolvable:$true] %s196_s11 }
  0x10   : > { %p2435_p12 = pneg %p2692_p10  ;;  %s2502_s12 = scalar_lea.vmem %s197_s11, 16 }
  0x11   : > { %p2503_p0 = scmp.ne.s32.totalorder %s197_s11, %s2502_s12  ;;  %p2510_p5 = scmp.lt.s32.totalorder %s197_s11, %s197_s11 }
  0x12   : > { %p2436_p13 = pnand %p2696_p11, %p2435_p12  ;;  %p2511_p6 = scmp.lt.s32.totalorder %s2502_s12, %s2502_s12 }
  0x14   : > { %p2504_p1 = pneg %p2436_p13  ;;  %p2512_p7 = por %p2511_p6, %p2510_p5 }
  0x16   : > { %p2505_p2 = pnand %p2504_p1, %p2503_p0 }
  0x18   : > { %p2506_p3 = pneg %p2505_p2 }
  0x1a   : > { %p2513_p9 = pnand %p2512_p7, %p2506_p3 }
  0x1c   : > { %2516 = shalt.err (!%p2513_p9)
}
  0x1d   : > { %s2599_s13 = smov [#allocation2]   ;;  %234 = sbr.rel (%p2692_p10) target bundleno = 947 (0x3b3), region = 40 }
  0x1e   : > { %2438 = dma.vmem_to_smem (!%p2436_p13), %s197_s11, 16, %s2599_s13, [#allocation4]  }
  0x22   : > { %2568 = dma.done.wait (%p2696_p11), [#allocation4], 16  }
  0x23   : > { %2570 = vsyncadd (%p2696_p11), [#allocation4], 4294967280 }
  0x24   : > { %240 = sfence }
  0x25   : > { %s268_s14 = sand.u32 1, %s2581_s19   ;;  %p271_p12 = scmp.lt.s32.totalorder %s2589_s21, 1  ;;  %v300_v0 = vld [vmem:[%s2943_s3] sm:$0xff]  ;;  %vm305_vm0 = vcmask 64512   ;;  %v2600_v1 = vmov 0.0   ;;  %vm2601_vm1 = vmmov 0  }
  0x26   : > { %2308 = vmatprep.subr.mxu0 %v2600_v1  ;;  %s2428_s17 = smul.u32 40, %s268_s14  ;;  %2310 = vmatprep.mubr.msk.f32.mxu0 %vm2601_vm1, %v2600_v1  ;;  %v307_v2 = vsel %vm305_vm0, %v300_v0, 0  ;;  %v293_v3 = vld [vmem:[%s2944_s4] sm:$0xff]  ;;  %v2602_v5 = vmov 0   ;;  %s2780_s11 = sld [smem:[#allocation2 + $0x1]] }
  0x27   : > { %s2727_s27 = scalar_select %p271_p12, %s2589_s21, 1  ;;  %v2729_v4 = vand.u32 4294901760, %v307_v2  ;;  %2313 = vmatprep.subr.mxu1 %v2600_v1  ;;  %2315 = vmatprep.mubr.msk.f32.mxu1 %vm2601_vm1, %v2600_v1 }
  0x28   : > { %2501 = vset.pattern.permute.xlu0 %v2602_v5  ;;  %s2746_s10 = scalar_lea.vmem [#allocation5], %s2428_s17  ;;  %s284_s12 = sld [smem:[#allocation2]] }
  0x29   : > { %s2250_s29 = sshll.u32 %s2727_s27, 3  ;;  %v2736_v6 = vsub.f32 %v307_v2, %v2729_v4  ;;  %296 = vperm.xlu0 %2501, %v293_v3   ;;  %s283_s7 = scalar_lea.vmem %s2942_s2, %s2727_s27 }
  0x2a   : > { %s277_s9 = scalar_lea.vmem %s2941_s1, %s2250_s29  ;;  %v2789_v16 = vld [vmem:[%s283_s7] ss:$0 sm:$0xff] }
  0x2b   : > { %v2741_v7 = vld [vmem:[%s277_s9] sm:$0xff]  ;;  %v2744_v8 = vand.u32 4294901760, %v2736_v6  ;;  %s2257_s9 = sshll.u32 %s2589_s21, 7 }
  0x2c   : > { %302 = vst [vmem:[%s2746_s10] sm:$0xff] %v2741_v7  ;;  %v340_v9 = vand.u32 4294901760, %v2741_v7  ;;  %s1219_s13 = smul.f32 2.0, %s2780_s11  ;;  %v2801_v45 = vstv %s2780_s11 }
  0x2d   : > { %v378_v10 = vsub.f32 %v2736_v6, %v2744_v8  ;;  %s1675_s15 = smul.f32 3.0, %s2780_s11 }
  0x2e   : > { %2309 = vmatpush3.msra.mxu0 %v340_v9  ;;  %v417_v11 = vsub.f32 %v2741_v7, %v340_v9  ;;  %s764_s16 = sadd.f32 %s2780_s11, %s284_s12  ;;  %s303_s8 = smul.f32 0.0, %s2780_s11 }
  0x2f   : > { %v2754_v12 = vand.u32 4294901760, %v378_v10  ;;  %2318 = vmatprep.subr.mxu0 %v2600_v1  ;;  %s1220_s17 = sadd.f32 %s1219_s13, %s284_s12  ;;  %s2145_s11 = sshll.u32 %s2746_s10, 4  ;;  %s2890_s11 = int_to_ptr.vmem [resolvable:$true] %s2145_s11 }
  0x30   : > { %v418_v13 = vand.u32 4294901760, %v417_v11  ;;  %s1676_s24 = sadd.f32 %s1675_s15, %s284_s12  ;;  %v1212_v18 = vstv %s764_s16  ;;  %s2888_s15 = scalar_lea.hbm %s2945_s5, %s2257_s9 }
  0x31   : > { %2311 = vmatmul.mubr.f32.vlgmr.msra.gmra.mxu0 %v2754_v12  ;;  %v1668_v19 = vstv %s1220_s17  ;;  %s304_s27 = sadd.f32 %s303_s8, %s284_s12  ;;  %s2895_s16 = scalar_lea.sflag [#allocation3], %s268_s14 }
  0x32   : > { %v419_v14 = vsub.f32 %v417_v11, %v418_v13  ;;  %2319 = vmatpush3.msra.mxu0 %v417_v11  ;;  %2320 = vmatprep.mubr.msk.f32.mxu0 %vm2601_vm1, %v2600_v1  ;;  %v2124_v20 = vstv %s1676_s24  ;;  %s2517_s21 = scalar_lea.vmem %s2890_s11, 640  ;;  %s2603_s17 = smov [#allocation5]  }
  0x33   : > { %2328 = vmatprep.subr.mxu0 %v2600_v1  ;;  %v756_v38 = vstv %s304_s27  ;;  %p2518_p10 = scmp.ne.s32.totalorder %s2890_s11, %s2517_s21  ;;  %s2521_s24 = sshll.u32 %s2603_s17, 4  ;;  %s2522_s24 = int_to_ptr.vmem [resolvable:$false] %s2521_s24 }
  0x34   : > { %v420_v15 = vand.u32 4294901760, %v419_v14  ;;  %s2523_s25 = scalar_lea.vmem %s2522_s24, 1280  ;;  %p2524_p0 = scmp.lt.s32.totalorder %s2890_s11, %s2522_s24 }
  0x35   : > { %2321 = vmatmul.mubr.f32.vlgmr.msra.gmra.mxu0 %v2736_v6  ;;  %p2519_p11 = pnand %p2518_p10, %p2677_p4  ;;  %p2525_p1 = scmp.lt.s32.totalorder %s2523_s25, %s2517_s21 }
  0x36   : > { %2314 = vmatpush3.msra.mxu1 %v420_v15  ;;  %2329 = vmatpush3.msra.mxu0 %v418_v13 }
  0x37   : > { %2316 = vmatmul.mubr.f32.vlgmr.msra.gmra.mxu1 %v2729_v4  ;;  %2323 = vmatprep.subr.mxu1 %v2600_v1  ;;  %p2520_p13 = pneg %p2519_p11  ;;  %p2526_p2 = por %p2525_p1, %p2524_p0 }
  0x38   : > { %2324 = vmatpush3.msra.mxu1 %v340_v9  ;;  %2325 = vmatprep.mubr.msk.f32.mxu1 %vm2601_vm1, %v2600_v1 }
  0x39   : > { %2330 = vmatprep.mubr.msk.f32.mxu0 %vm2601_vm1, %v2600_v1  ;;  %2333 = vmatprep.subr.mxu1 %v2600_v1  ;;  %p2527_p3 = pnand %p2526_p2, %p2520_p13 }
  0x3a   : > { %2331 = vmatmul.mubr.f32.vlgmr.msra.gmra.mxu0 %v2729_v4  ;;  %2338 = vmatprep.subr.mxu0 %v2600_v1 }
  0x3b   : > { %2326 = vmatmul.mubr.f32.vlgmr.msra.gmra.mxu1 %v2744_v8  ;;  %2340 = vmatprep.mubr.msk.f32.mxu0 %vm2601_vm1, %v2600_v1 }
  0x3c   : > { %2334 = vmatpush3.msra.mxu1 %v340_v9  ;;  %2335 = vmatprep.mubr.msk.f32.mxu1 %vm2601_vm1, %v2600_v1 }
  0x3d   : > { %2343 = vmatprep.subr.mxu1 %v2600_v1 }
  0x3f   : > { %2336 = vmatmul.mubr.f32.vlgmr.msra.gmra.mxu1 %v2729_v4 }
  0x40   : > { %2345 = vmatprep.mubr.msk.f32.mxu1 %vm2601_vm1, %v2600_v1 }
  0xa4   : > { %v297_v17 = vpop.permute.xlu0 %296 }
  0xa5   : > { %v299_v21 = vmul.f32 %v2789_v16, %v297_v17 }
  0xa7   : > { %v2792_v22 = vmul.f32 %v1212_v18, %v299_v21  ;;  %v2794_v23 = vmul.f32 %v1668_v19, %v299_v21  ;;  %v2796_v24 = vmul.f32 %v2124_v20, %v299_v21  ;;  %v757_v42 = vmul.f32 %v756_v38, %v299_v21 }
  0xf1   : > { %v381_v25 = vpop.f32.mrf.mxu0 }
  0xf3   : > { %v2312_v26 = vpop.f32.mrf.mxu0 }
  0xf5   : > { %v531_v27 = vpop.f32.mrf.mxu0 }
  0xf7   : > { %v457_v28 = vpop.f32.mrf.mxu1  ;;  %v2322_v29 = vpop.f32.mrf.mxu0 }
  0xf8   : > { %v458_v30 = vadd.f32 %v457_v28, %v381_v25 }
  0xf9   : > { %v2317_v31 = vpop.f32.mrf.mxu1 }
  0xfa   : > { %v532_v32 = vadd.f32 %v531_v27, %v458_v30  ;;  %v679_v33 = vpop.f32.mrf.mxu0 }
  0xfb   : > { %v605_v34 = vpop.f32.mrf.mxu1 }
  0xfc   : > { %v606_v35 = vadd.f32 %v605_v34, %v532_v32  ;;  %v2332_v36 = vpop.f32.mrf.mxu0 }
  0xfd   : > { %v2327_v37 = vpop.f32.mrf.mxu1 }
  0xfe   : > { %v680_v39 = vadd.f32 %v679_v33, %v606_v35 }
  0xff   : > { %v751_v40 = vpop.f32.mrf.mxu1 }
 0x100   : > { %v752_v41 = vadd.f32 %v751_v40, %v680_v39 }
 0x101   : > { %v2337_v43 = vpop.f32.mrf.mxu1 }
 0x102   : > { %v755_v44 = vmul.f32 %v2789_v16, %v752_v41 }
 0x104   : > { %v758_v46 = vadd.f32 %v757_v42, %v755_v44 }
 0x106   : > { %v760_v47 = vmul.f32 %v2801_v45, %v758_v46 }
 0x108   : > { %v761_v48 = vadd.f32 %v760_v47, %v2741_v7 }
 0x10a   : > { %2253 = vst [vmem:[%s2746_s10 + $0x8] sm:$0xff] %v761_v48  ;;  %v796_v49 = vand.u32 4294901760, %v761_v48 }
 0x10c   : > { %2339 = vmatpush3.msra.mxu0 %v796_v49  ;;  %v873_v50 = vsub.f32 %v761_v48, %v796_v49 }
 0x10d   : > { %2341 = vmatmul.mubr.f32.vlgmr.msra.gmra.mxu0 %v2754_v12  ;;  %2348 = vmatprep.subr.mxu0 %v2600_v1 }
 0x10e   : > { %2349 = vmatpush3.msra.mxu0 %v873_v50  ;;  %2350 = vmatprep.mubr.msk.f32.mxu0 %vm2601_vm1, %v2600_v1  ;;  %v874_v51 = vand.u32 4294901760, %v873_v50 }
 0x10f   : > { %2358 = vmatprep.subr.mxu0 %v2600_v1 }
 0x110   : > { %v875_v52 = vsub.f32 %v873_v50, %v874_v51 }
 0x111   : > { %2351 = vmatmul.mubr.f32.vlgmr.msra.gmra.mxu0 %v2736_v6 }
 0x112   : > { %2359 = vmatpush3.msra.mxu0 %v874_v51  ;;  %v876_v53 = vand.u32 4294901760, %v875_v52  ;;  %2360 = vmatprep.mubr.msk.f32.mxu0 %vm2601_vm1, %v2600_v1 }
 0x113   : > { %2368 = vmatprep.subr.mxu0 %v2600_v1 }
 0x114   : > { %2344 = vmatpush3.msra.mxu1 %v876_v53 }
 0x115   : > { %2346 = vmatmul.mubr.f32.vlgmr.msra.gmra.mxu1 %v2729_v4  ;;  %2353 = vmatprep.subr.mxu1 %v2600_v1 }
 0x116   : > { %2354 = vmatpush3.msra.mxu1 %v796_v49  ;;  %2355 = vmatprep.mubr.msk.f32.mxu1 %vm2601_vm1, %v2600_v1 }
 0x117   : > { %2363 = vmatprep.subr.mxu1 %v2600_v1  ;;  %2361 = vmatmul.mubr.f32.vlgmr.msra.gmra.mxu0 %v2729_v4 }
 0x118   : > { %2370 = vmatprep.mubr.msk.f32.mxu0 %vm2601_vm1, %v2600_v1 }
 0x119   : > { %2356 = vmatmul.mubr.f32.vlgmr.msra.gmra.mxu1 %v2744_v8 }
 0x11a   : > { %2364 = vmatpush3.msra.mxu1 %v796_v49  ;;  %2365 = vmatprep.mubr.msk.f32.mxu1 %vm2601_vm1, %v2600_v1 }
 0x11b   : > { %2373 = vmatprep.subr.mxu1 %v2600_v1 }
 0x11d   : > { %2366 = vmatmul.mubr.f32.vlgmr.msra.gmra.mxu1 %v2729_v4 }
 0x11e   : > { %2375 = vmatprep.mubr.msk.f32.mxu1 %vm2601_vm1, %v2600_v1 }
 0x1cd   : > { %v837_v54 = vpop.f32.mrf.mxu0 }
 0x1cf   : > { %v2342_v55 = vpop.f32.mrf.mxu0 }
 0x1d1   : > { %v987_v56 = vpop.f32.mrf.mxu0 }
 0x1d3   : > { %v2352_v57 = vpop.f32.mrf.mxu0 }
 0x1d5   : > { %v913_v58 = vpop.f32.mrf.mxu1 }
 0x1d6   : > { %v914_v59 = vadd.f32 %v913_v58, %v837_v54 }
 0x1d7   : > { %v2347_v60 = vpop.f32.mrf.mxu1  ;;  %v1135_v61 = vpop.f32.mrf.mxu0 }
 0x1d8   : > { %v988_v62 = vadd.f32 %v987_v56, %v914_v59 }
 0x1d9   : > { %v1061_v63 = vpop.f32.mrf.mxu1  ;;  %v2362_v0 = vpop.f32.mrf.mxu0 }
 0x1da   : > { %v1062_v2 = vadd.f32 %v1061_v63, %v988_v62 }
 0x1db   : > { %v2357_v3 = vpop.f32.mrf.mxu1 }
 0x1dc   : > { %v1136_v5 = vadd.f32 %v1135_v61, %v1062_v2 }
 0x1dd   : > { %v1207_v7 = vpop.f32.mrf.mxu1 }
 0x1de   : > { %v1208_v9 = vadd.f32 %v1207_v7, %v1136_v5 }
 0x1df   : > { %v2367_v10 = vpop.f32.mrf.mxu1 }
 0x1e0   : > { %v1211_v11 = vmul.f32 %v2789_v16, %v1208_v9 }
 0x1e2   : > { %v1214_v13 = vadd.f32 %v2792_v22, %v1211_v11 }
 0x1e4   : > { %v1215_v14 = vmul.f32 %v1214_v13, %v2801_v45 }
 0x1e6   : > { %v1216_v15 = vadd.f32 %v1215_v14, %v761_v48 }
 0x1e8   : > { %2254 = vst [vmem:[%s2746_s10 + $0x10] sm:$0xff] %v1216_v15  ;;  %v1252_v17 = vand.u32 4294901760, %v1216_v15 }
 0x1ea   : > { %2369 = vmatpush3.msra.mxu0 %v1252_v17  ;;  %v1329_v18 = vsub.f32 %v1216_v15, %v1252_v17 }
 0x1eb   : > { %2371 = vmatmul.mubr.f32.vlgmr.msra.gmra.mxu0 %v2754_v12  ;;  %2378 = vmatprep.subr.mxu0 %v2600_v1 }
 0x1ec   : > { %2379 = vmatpush3.msra.mxu0 %v1329_v18  ;;  %2380 = vmatprep.mubr.msk.f32.mxu0 %vm2601_vm1, %v2600_v1  ;;  %v1330_v19 = vand.u32 4294901760, %v1329_v18 }
 0x1ed   : > { %2388 = vmatprep.subr.mxu0 %v2600_v1 }
 0x1ee   : > { %v1331_v20 = vsub.f32 %v1329_v18, %v1330_v19 }
 0x1ef   : > { %2381 = vmatmul.mubr.f32.vlgmr.msra.gmra.mxu0 %v2736_v6 }
 0x1f0   : > { %2389 = vmatpush3.msra.mxu0 %v1330_v19  ;;  %v1332_v21 = vand.u32 4294901760, %v1331_v20  ;;  %2390 = vmatprep.mubr.msk.f32.mxu0 %vm2601_vm1, %v2600_v1 }
 0x1f1   : > { %2398 = vmatprep.subr.mxu0 %v2600_v1 }
 0x1f2   : > { %2374 = vmatpush3.msra.mxu1 %v1332_v21 }
 0x1f3   : > { %2376 = vmatmul.mubr.f32.vlgmr.msra.gmra.mxu1 %v2729_v4  ;;  %2383 = vmatprep.subr.mxu1 %v2600_v1 }
 0x1f4   : > { %2384 = vmatpush3.msra.mxu1 %v1252_v17  ;;  %2385 = vmatprep.mubr.msk.f32.mxu1 %vm2601_vm1, %v2600_v1 }
 0x1f5   : > { %2393 = vmatprep.subr.mxu1 %v2600_v1  ;;  %2391 = vmatmul.mubr.f32.vlgmr.msra.gmra.mxu0 %v2729_v4 }
 0x1f6   : > { %2400 = vmatprep.mubr.msk.f32.mxu0 %vm2601_vm1, %v2600_v1 }
 0x1f7   : > { %2386 = vmatmul.mubr.f32.vlgmr.msra.gmra.mxu1 %v2744_v8 }
 0x1f8   : > { %2394 = vmatpush3.msra.mxu1 %v1252_v17  ;;  %2395 = vmatprep.mubr.msk.f32.mxu1 %vm2601_vm1, %v2600_v1 }
 0x1f9   : > { %2403 = vmatprep.subr.mxu1 %v2600_v1 }
 0x1fb   : > { %2396 = vmatmul.mubr.f32.vlgmr.msra.gmra.mxu1 %v2729_v4 }
 0x1fc   : > { %2405 = vmatprep.mubr.msk.f32.mxu1 %vm2601_vm1, %v2600_v1 }
 0x2ab   : > { %v1293_v22 = vpop.f32.mrf.mxu0 }
 0x2ad   : > { %v2372_v25 = vpop.f32.mrf.mxu0 }
 0x2af   : > { %v1443_v26 = vpop.f32.mrf.mxu0 }
 0x2b1   : > { %v2382_v27 = vpop.f32.mrf.mxu0 }
 0x2b3   : > { %v1369_v28 = vpop.f32.mrf.mxu1 }
 0x2b4   : > { %v1370_v29 = vadd.f32 %v1369_v28, %v1293_v22 }
 0x2b5   : > { %v2377_v30 = vpop.f32.mrf.mxu1  ;;  %v1591_v31 = vpop.f32.mrf.mxu0 }
 0x2b6   : > { %v1444_v32 = vadd.f32 %v1443_v26, %v1370_v29 }
 0x2b7   : > { %v1517_v33 = vpop.f32.mrf.mxu1  ;;  %v2392_v34 = vpop.f32.mrf.mxu0 }
 0x2b8   : > { %v1518_v35 = vadd.f32 %v1517_v33, %v1444_v32 }
 0x2b9   : > { %v2387_v36 = vpop.f32.mrf.mxu1 }
 0x2ba   : > { %v1592_v37 = vadd.f32 %v1591_v31, %v1518_v35 }
 0x2bb   : > { %v1663_v38 = vpop.f32.mrf.mxu1 }
 0x2bc   : > { %v1664_v39 = vadd.f32 %v1663_v38, %v1592_v37 }
 0x2bd   : > { %v2397_v40 = vpop.f32.mrf.mxu1 }
 0x2be   : > { %v1667_v41 = vmul.f32 %v2789_v16, %v1664_v39 }
 0x2c0   : > { %v1670_v42 = vadd.f32 %v2794_v23, %v1667_v41 }
 0x2c2   : > { %v1671_v43 = vmul.f32 %v1670_v42, %v2801_v45 }
 0x2c4   : > { %v1672_v44 = vadd.f32 %v1671_v43, %v1216_v15 }
 0x2c6   : > { %2255 = vst [vmem:[%s2746_s10 + $0x18] sm:$0xff] %v1672_v44  ;;  %v1708_v46 = vand.u32 4294901760, %v1672_v44 }
 0x2c8   : > { %2399 = vmatpush3.msra.mxu0 %v1708_v46  ;;  %v1785_v47 = vsub.f32 %v1672_v44, %v1708_v46 }
 0x2c9   : > { %2401 = vmatmul.mubr.f32.vlgmr.msra.gmra.mxu0 %v2754_v12  ;;  %2408 = vmatprep.subr.mxu0 %v2600_v1 }
 0x2ca   : > { %2409 = vmatpush3.msra.mxu0 %v1785_v47  ;;  %2410 = vmatprep.mubr.msk.f32.mxu0 %vm2601_vm1, %v2600_v1  ;;  %v1786_v48 = vand.u32 4294901760, %v1785_v47 }
 0x2cb   : > { %2418 = vmatprep.subr.mxu0 %v2600_v1 }
 0x2cc   : > { %v1787_v49 = vsub.f32 %v1785_v47, %v1786_v48 }
 0x2cd   : > { %2411 = vmatmul.mubr.f32.vlgmr.msra.gmra.mxu0 %v2736_v6 }
 0x2ce   : > { %2419 = vmatpush3.msra.mxu0 %v1786_v48  ;;  %v1788_v23 = vand.u32 4294901760, %v1787_v49  ;;  %2420 = vmatprep.mubr.msk.f32.mxu0 %vm2601_vm1, %v2600_v1 }
 0x2d0   : > { %2404 = vmatpush3.msra.mxu1 %v1788_v23 }
 0x2d1   : > { %2406 = vmatmul.mubr.f32.vlgmr.msra.gmra.mxu1 %v2729_v4  ;;  %2413 = vmatprep.subr.mxu1 %v2600_v1 }
 0x2d2   : > { %2414 = vmatpush3.msra.mxu1 %v1708_v46  ;;  %2415 = vmatprep.mubr.msk.f32.mxu1 %vm2601_vm1, %v2600_v1 }
 0x2d3   : > { %2423 = vmatprep.subr.mxu1 %v2600_v1  ;;  %2421 = vmatmul.mubr.f32.vlgmr.msra.gmra.mxu0 %v2729_v4 }
 0x2d5   : > { %2416 = vmatmul.mubr.f32.vlgmr.msra.gmra.mxu1 %v2744_v8 }
 0x2d6   : > { %2424 = vmatpush3.msra.mxu1 %v1708_v46  ;;  %2425 = vmatprep.mubr.msk.f32.mxu1 %vm2601_vm1, %v2600_v1 }
 0x2d9   : > { %2426 = vmatmul.mubr.f32.vlgmr.msra.gmra.mxu1 %v2729_v4 }
 0x389   : > { %v1749_v6 = vpop.f32.mrf.mxu0 }
 0x38b   : > { %v2402_v12 = vpop.f32.mrf.mxu0 }
 0x38d   : > { %v1899_v50 = vpop.f32.mrf.mxu0 }
 0x38f   : > { %v2412_v51 = vpop.f32.mrf.mxu0 }
 0x391   : > { %v1825_v52 = vpop.f32.mrf.mxu1 }
 0x392   : > { %v1826_v53 = vadd.f32 %v1825_v52, %v1749_v6 }
 0x393   : > { %v2407_v54 = vpop.f32.mrf.mxu1  ;;  %v2047_v55 = vpop.f32.mrf.mxu0 }
 0x394   : > { %v1900_v56 = vadd.f32 %v1899_v50, %v1826_v53 }
 0x395   : > { %v1973_v57 = vpop.f32.mrf.mxu1  ;;  %v2422_v8 = vpop.f32.mrf.mxu0 }
 0x396   : > { %v1974_v58 = vadd.f32 %v1973_v57, %v1900_v56 }
 0x397   : > { %v2417_v59 = vpop.f32.mrf.mxu1 }
 0x398   : > { %v2048_v1 = vadd.f32 %v2047_v55, %v1974_v58 }
 0x399   : > { %v2119_v4 = vpop.f32.mrf.mxu1 }
 0x39a   : > { %v2120_v60 = vadd.f32 %v2119_v4, %v2048_v1 }
 0x39b   : > { %v2427_v61 = vpop.f32.mrf.mxu1 }
 0x39c   : > { %v2123_v62 = vmul.f32 %v2789_v16, %v2120_v60 }
 0x39e   : > { %v2126_v63 = vadd.f32 %v2796_v24, %v2123_v62 }
 0x3a0   : > { %v2127_v0 = vmul.f32 %v2126_v63, %v2801_v45 }
 0x3a2   : > { %v2128_v2 = vadd.f32 %v2127_v0, %v1672_v44 }
 0x3a4   : > { %2256 = vst [vmem:[%s2746_s10 + $0x20] sm:$0xff] %v2128_v2 }
 0x3a5   : > { %2530 = shalt.err (!%p2527_p3)
}
 0x3a6   : > { %s2531_s14 = scalar_lea.hbm %s2888_s15, 640  ;;  %s2535_s7 = scalar_lea.hbm %s2945_s5, 1280 }
 0x3a7   : > { %p2532_p5 = scmp.ne.s32.totalorder %s2888_s15, %s2531_s14  ;;  %p2536_p9 = scmp.lt.s32.totalorder %s2888_s15, %s2945_s5 }
 0x3a8   : > { %p2537_p12 = scmp.lt.s32.totalorder %s2535_s7, %s2531_s14 }
 0x3a9   : > { %p2533_p6 = pnand %p2532_p5, %p2677_p4 }
 0x3aa   : > { %p2538_p10 = por %p2537_p12, %p2536_p9 }
 0x3ab   : > { %p2534_p7 = pneg %p2533_p6 }
 0x3ad   : > { %p2539_p11 = pnand %p2538_p10, %p2534_p7 }
 0x3af   : > { %2542 = shalt.err (!%p2539_p11)
}
 0x3b0   : > { %s2604_s9 = smov 128   ;;  %s2605_s12 = smov 256  }
 0x3b1   : > { %s2606_s13 = smov 8  }
 0x3b2   : > { %2433 = dma.vmem_to_hbm [thread:$0]  (%p2677_p4), %s2890_s11, 640, %s2888_s15, %s2895_s16, %s2604_s9, %s2605_s12, %s2606_s13  }
 0x3b3 PF: > { %p2445_p13 = scmp.ge.s32.totalorder %s2597_s23, 2  ;;  %s2160_s21 = sand.u32 1, %s2577_s18  }
 0x3b4   : > { %s2161_s17 = scalar_lea.sflag [#allocation3], %s2160_s21 }
 0x3b5   : > { %p2440_p0 = pnand %p2445_p13, %p2684_p8 }
 0x3b7   : > { %p2441_p1 = pneg %p2440_p0 }
 0x3b9   : > { %2572 = dma.done.wait (%p2441_p1), %s2161_s17, 640  }
 0x3ba   : > { %2574 = vsyncadd (%p2441_p1), %s2161_s17, 4294966656  ;;  %s19_s23 = sadd.s32 1, %s2597_s23   ;;  %s2950_s18 = smov %s2581_s19 }
 0x3bb   : > { %p16_p2 = scmp.ge.s32.totalorder %s19_s23, 4   ;;  %s2951_s19 = smov %s2585_s20 }
 0x3bc   : > { %s2952_s20 = smov %s2690_s6  ;;  %s2953_s21 = smov %s2593_s22 }
 0x3bd   : > { %s2954_s22 = smov %s2956_s26  ;;  %18 = sbr.rel (!%p16_p2) target bundleno = 5 (0x5), region = 87 }
 0x3c2   :  { %2166 = vsyncpa [#allocation3], 1 }
 0x3c3   :  { %2168 = vsyncpa [#allocation3 + $0x1], 1 }
 0x3c4   :  { %2169 = vsyncpa [#allocation4], 1 }
 0x3c5   :  { %2171 = vsyncpa [#allocation4 + $0x1], 1 }

</bundles_post_ra>
